<compile_context>
chip_gen: v6e
topology: v6e:2x2x1
jax: 0.10.0
libtpu: 0.0.40
codegen_flags: <defaults>
</compile_context>

<pallas_src>
import math
import functools

import jax
import jax.numpy as jnp
from jax import lax
from jax.experimental import pallas as pl
from jax.experimental.pallas import tpu as pltpu


# ---------------------------------------------------------------------------
# Pallas kernel: attention core
# ---------------------------------------------------------------------------
def _attn_body(bias_ref, q_ref, k_ref, v_ref, out_ref, attn_ref, *,
               inv_temperature, d_v, mxu_dtype):
    hb = q_ref.shape[1]                                     # heads in this block

    q = q_ref[0].astype(jnp.float32) * inv_temperature      # (HB, TQ, Dk)
    k = k_ref[0].astype(jnp.float32)                        # (HB, Sk, Dk)
    v = v_ref[0]                                            # (HB, Sk, Dv)
    bias = bias_ref[0].astype(jnp.float32)                  # (TQ, Sk) additive mask

    # scores = (q / temperature) @ k^T : contract the last dims directly (no k.T).
    scores = lax.dot_general(
        q, k,
        dimension_numbers=(((2,), (2,)), ((0,), (0,))),
        preferred_element_type=jnp.float32)                 # (HB, TQ, Sk)
    scores = scores + bias[None, :, :]                      # masked positions -> -1e9

    # numerically stable softmax, kept in f32 so the returned attn is accurate
    m = jnp.max(scores, axis=-1, keepdims=True)
    e = jnp.exp(scores - m)
    denom = jnp.sum(e, axis=-1, keepdims=True)
    p = e * pl.reciprocal(denom, approx=True)               # (HB, TQ, Sk)

    # attn @ v on the MXU in bf16 (probabilities are in [0,1])
    out = lax.dot_general(
        p.astype(mxu_dtype), v.astype(mxu_dtype),
        dimension_numbers=(((2,), (1,)), ((0,), (0,))),
        preferred_element_type=jnp.float32)                 # (HB, TQ, Dv)

    # lane-packed output: heads of this block land contiguously in the lane dim
    for h in range(hb):
        out_ref[0, :, h * d_v:(h + 1) * d_v] = out[h].astype(out_ref.dtype)

    if attn_ref is not None:
        attn_ref[0] = p.astype(attn_ref.dtype)


def _attn_kernel_with_attn(bias_ref, q_ref, k_ref, v_ref, out_ref, attn_ref, *,
                           inv_temperature, d_v, mxu_dtype):
    _attn_body(bias_ref, q_ref, k_ref, v_ref, out_ref, attn_ref,
               inv_temperature=inv_temperature, d_v=d_v, mxu_dtype=mxu_dtype)


def _attn_kernel_no_attn(bias_ref, q_ref, k_ref, v_ref, out_ref, *,
                         inv_temperature, d_v, mxu_dtype):
    _attn_body(bias_ref, q_ref, k_ref, v_ref, out_ref, None,
               inv_temperature=inv_temperature, d_v=d_v, mxu_dtype=mxu_dtype)


# ---------------------------------------------------------------------------
# tiling helpers
# ---------------------------------------------------------------------------
def _pick_head_block(n_heads, d_v):
    # smallest divisor of H whose packed width (HB * d_v) is a multiple of 128 lanes;
    # otherwise take all heads (block then equals the full H*d_v output dim).
    for hb in range(1, n_heads + 1):
        if n_heads % hb == 0 and (hb * d_v) % 128 == 0:
            return hb
    return n_heads


def _pick_q_tile(seq_len, max_tq):
    if seq_len <= max_tq:
        return seq_len
    best = None
    for tq in range(8, max_tq + 1, 8):
        if seq_len % tq == 0:
            best = tq
    return best if best is not None else seq_len


# ---------------------------------------------------------------------------
# attention core wrapper (Pallas)
# ---------------------------------------------------------------------------
def saits_attention_core(q, k, v, attn_bias, *, return_attn=True, q_tile=256,
                         mxu_dtype=jnp.bfloat16):
    """q, k, v: (B, H, L, D). attn_bias: (B, Lq, Lk) additive bias (0 / -1e9).

    Returns (out_packed, attn) where out_packed is (B, Lq, H*Dv) with heads packed
    into the lane dimension, and attn is (B, H, Lq, Lk) f32 (or None).
    """
    B, H, Sq, Dk = q.shape
    Sk = k.shape[2]
    Dv = v.shape[3]
    assert k.shape == (B, H, Sk, Dk)
    assert v.shape == (B, H, Sk, Dv)
    assert attn_bias.shape == (B, Sq, Sk)

    hb = _pick_head_block(H, Dv)
    tq = _pick_q_tile(Sq, q_tile)
    inv_temperature = 1.0 / math.sqrt(Dk)

    grid = (B, H // hb, Sq // tq)

    bias_spec = pl.BlockSpec((1, tq, Sk), lambda b, h, i: (b, i, 0))
    q_spec = pl.BlockSpec((1, hb, tq, Dk), lambda b, h, i: (b, h, i, 0))
    k_spec = pl.BlockSpec((1, hb, Sk, Dk), lambda b, h, i: (b, h, 0, 0))
    v_spec = pl.BlockSpec((1, hb, Sk, Dv), lambda b, h, i: (b, h, 0, 0))
    out_spec = pl.BlockSpec((1, tq, hb * Dv), lambda b, h, i: (b, i, h))

    compiler_params = pltpu.CompilerParams(
        dimension_semantics=("parallel", "parallel", "parallel"),
        vmem_limit_bytes=48 * 1024 * 1024,   # explicit ceiling; safe on v7x (64 MiB VMEM)
    )

    if return_attn:
        kernel = functools.partial(_attn_kernel_with_attn,
                                   inv_temperature=inv_temperature,
                                   d_v=Dv, mxu_dtype=mxu_dtype)
        attn_spec = pl.BlockSpec((1, hb, tq, Sk), lambda b, h, i: (b, h, i, 0))
        out_packed, attn = pl.pallas_call(
            kernel,
            out_shape=(
                jax.ShapeDtypeStruct((B, Sq, H * Dv), q.dtype),
                jax.ShapeDtypeStruct((B, H, Sq, Sk), jnp.float32),
            ),
            grid_spec=pltpu.PrefetchScalarGridSpec(
                num_scalar_prefetch=0,
                grid=grid,
                in_specs=[bias_spec, q_spec, k_spec, v_spec],
                out_specs=[out_spec, attn_spec],
            ),
            compiler_params=compiler_params,
        )(attn_bias, q, k, v)
        return out_packed, attn

    kernel = functools.partial(_attn_kernel_no_attn,
                               inv_temperature=inv_temperature,
                               d_v=Dv, mxu_dtype=mxu_dtype)
    out_packed = pl.pallas_call(
        kernel,
        out_shape=jax.ShapeDtypeStruct((B, Sq, H * Dv), q.dtype),
        grid_spec=pltpu.PrefetchScalarGridSpec(
            num_scalar_prefetch=0,
            grid=grid,
            in_specs=[bias_spec, q_spec, k_spec, v_spec],
            out_specs=out_spec,
        ),
        compiler_params=compiler_params,
    )(attn_bias, q, k, v)
    return out_packed, None


# ---------------------------------------------------------------------------
# MultiHeadAttention forward (projections in XLA, attention core in Pallas)
# ---------------------------------------------------------------------------
def multi_head_attention(params, q_in, k_in, v_in, attn_mask, *, n_heads, d_k, d_v,
                         return_attn=True):
    B, Lq, _ = q_in.shape
    Lk = k_in.shape[1]
    Lv = v_in.shape[1]

    q = jnp.dot(q_in, params["w_qs"]).reshape(B, Lq, n_heads, d_k).transpose(0, 2, 1, 3)
    k = jnp.dot(k_in, params["w_ks"]).reshape(B, Lk, n_heads, d_k).transpose(0, 2, 1, 3)
    v = jnp.dot(v_in, params["w_vs"]).reshape(B, Lv, n_heads, d_v).transpose(0, 2, 1, 3)

    # additive mask bias: 0 in attn_mask => masked out (module docstring convention)
    if attn_mask is None:
        bias = jnp.zeros((B, Lq, Lk), dtype=jnp.bfloat16)
    else:
        if attn_mask.ndim == 4:          # (B, 1, Lq, Lk) -> (B, Lq, Lk)
            attn_mask = attn_mask[:, 0]
        bias = jnp.where(attn_mask == 0, jnp.float32(-1e9),
                         jnp.float32(0.0)).astype(jnp.bfloat16)

    out_packed, attn = saits_attention_core(q, k, v, bias, return_attn=return_attn)
    # out_packed is already (B, Lq, n_heads*d_v) with heads packed into the lane dim —
    # exactly what fc consumes, so no transpose/reshape is needed here.
    out = jnp.dot(out_packed, params["fc"])
    return out, attn


def init_params(key, d_model, n_heads, d_k, d_v):
    def lin(k, fan_in, fan_out):
        bound = 1.0 / math.sqrt(fan_in)
        return jax.random.uniform(k, (fan_in, fan_out), jnp.float32, -bound, bound)

    k1, k2, k3, k4 = jax.random.split(key, 4)
    return {
        "w_qs": lin(k1, d_model, n_heads * d_k),
        "w_ks": lin(k2, d_model, n_heads * d_k),
        "w_vs": lin(k3, d_model, n_heads * d_v),
        "fc": lin(k4, n_heads * d_v, d_model),
    }


# ---------------------------------------------------------------------------
# pure-JAX reference
# ---------------------------------------------------------------------------
def _reference_mha(params, q_in, k_in, v_in, attn_mask, *, n_heads, d_k, d_v):
    B, Lq, _ = q_in.shape
    Lk = k_in.shape[1]
    q = jnp.dot(q_in, params["w_qs"]).reshape(B, Lq, n_heads, d_k).transpose(0, 2, 1, 3)
    k = jnp.dot(k_in, params["w_ks"]).reshape(B, Lk, n_heads, d_k).transpose(0, 2, 1, 3)
    v = jnp.dot(v_in, params["w_vs"]).reshape(B, Lk, n_heads, d_v).transpose(0, 2, 1, 3)

    scores = jnp.einsum("bhqd,bhkd->bhqk", q, k) / math.sqrt(d_k)
    if attn_mask is not None:
        scores = jnp.where(attn_mask[:, None, :, :] == 0, -1e9, scores)
    attn = jax.nn.softmax(scores, axis=-1)
    out = jnp.einsum("bhqk,bhkd->bhqd", attn, v)
    out = out.transpose(0, 2, 1, 3).reshape(B, Lq, n_heads * d_v)
    out = jnp.dot(out, params["fc"])
    return out, attn


if __name__ == "__main__":
    B, S, d_model, H, Dk, Dv = 2, 8, 32, 4, 16, 16

    key = jax.random.PRNGKey(0)
    kp, kq, kk, kv, km = jax.random.split(key, 5)
    params = init_params(kp, d_model, H, Dk, Dv)
    q_in = jax.random.normal(kq, (B, S, d_model), dtype=jnp.float32)
    k_in = jax.random.normal(kk, (B, S, d_model), dtype=jnp.float32)
    v_in = jax.random.normal(kv, (B, S, d_model), dtype=jnp.float32)
    # attn_mask: 0 = masked out, 1 = keep (~25% masked)
    attn_mask = (jax.random.uniform(km, (B, S, S)) > 0.25).astype(jnp.float32)

    # full path (module semantics: returns both output and attention weights)
    out, attn = multi_head_attention(params, q_in, k_in, v_in, attn_mask,
                                     n_heads=H, d_k=Dk, d_v=Dv, return_attn=True)
    out = jax.block_until_ready(out)
    attn = jax.block_until_ready(attn)

    # output-only fast path (skips the (B,H,S,S) attention writeback entirely)
    out_fast, _ = multi_head_attention(params, q_in, k_in, v_in, attn_mask,
                                       n_heads=H, d_k=Dk, d_v=Dv, return_attn=False)
    out_fast = jax.block_until_ready(out_fast)

    ref_out, ref_attn = _reference_mha(params, q_in, k_in, v_in, attn_mask,
                                       n_heads=H, d_k=Dk, d_v=Dv)

    # attn is computed/stored in f32 (EUP approx reciprocal only); out uses bf16 p@v on the MXU
    assert jnp.allclose(attn, ref_attn, atol=5e-3, rtol=5e-3)
    assert jnp.allclose(out, ref_out, atol=2e-2, rtol=2e-2)
    assert jnp.allclose(out_fast, ref_out, atol=2e-2, rtol=2e-2)
    print("KERNEL_OK")
</pallas_src>

<mosaic_0001>
module attributes {stable_mosaic.version = 11 : i64} {
  func.func @_attn_kernel_with_attn(%arg0: i32, %arg1: i32, %arg2: i32, %arg3: memref<1x8x8xbf16, #tpu.memory_space<vmem>>, %arg4: memref<1x4x8x16xf32, #tpu.memory_space<vmem>>, %arg5: memref<1x4x8x16xf32, #tpu.memory_space<vmem>>, %arg6: memref<1x4x8x16xf32, #tpu.memory_space<vmem>>, %arg7: memref<1x8x64xf32, #tpu.memory_space<vmem>>, %arg8: memref<1x4x8x8xf32, #tpu.memory_space<vmem>>) attributes {dimension_semantics = [#tpu.dimension_semantics<parallel>, #tpu.dimension_semantics<parallel>, #tpu.dimension_semantics<parallel>], iteration_bounds = array<i64: 2, 1, 1>, scalar_prefetch = 0 : i64, scratch_operands = 0 : i64, tpu.core_type = #tpu.core_type<tc>, window_params = [{transform_indices = @transform_0, window_bounds = array<i64: 1, 8, 8>}, {transform_indices = @transform_1, window_bounds = array<i64: 1, 4, 8, 16>}, {transform_indices = @transform_2, window_bounds = array<i64: 1, 4, 8, 16>}, {transform_indices = @transform_3, window_bounds = array<i64: 1, 4, 8, 16>}, {transform_indices = @transform_4, window_bounds = array<i64: 1, 8, 64>}, {transform_indices = @transform_5, window_bounds = array<i64: 1, 4, 8, 8>}]} {
    %c0 = arith.constant 0 : index
    %c0_0 = arith.constant 0 : index
    %c0_1 = arith.constant 0 : index
    %c0_2 = arith.constant 0 : index
    %0 = vector.load %arg4[%c0, %c0_0, %c0_1, %c0_2] : memref<1x4x8x16xf32, #tpu.memory_space<vmem>>, vector<1x4x8x16xf32>
    %1 = vector.shape_cast %0 : vector<1x4x8x16xf32> to vector<4x8x16xf32>
    %cst = arith.constant 2.500000e-01 : f32
    %2 = vector.broadcast %cst : f32 to vector<4x8x16xf32>
    %3 = arith.mulf %1, %2 : vector<4x8x16xf32>
    %c0_3 = arith.constant 0 : index
    %c0_4 = arith.constant 0 : index
    %c0_5 = arith.constant 0 : index
    %c0_6 = arith.constant 0 : index
    %4 = vector.load %arg5[%c0_3, %c0_4, %c0_5, %c0_6] : memref<1x4x8x16xf32, #tpu.memory_space<vmem>>, vector<1x4x8x16xf32>
    %5 = vector.shape_cast %4 : vector<1x4x8x16xf32> to vector<4x8x16xf32>
    %c0_7 = arith.constant 0 : index
    %c0_8 = arith.constant 0 : index
    %c0_9 = arith.constant 0 : index
    %c0_10 = arith.constant 0 : index
    %6 = vector.load %arg6[%c0_7, %c0_8, %c0_9, %c0_10] : memref<1x4x8x16xf32, #tpu.memory_space<vmem>>, vector<1x4x8x16xf32>
    %7 = vector.shape_cast %6 : vector<1x4x8x16xf32> to vector<4x8x16xf32>
    %c0_11 = arith.constant 0 : index
    %c0_12 = arith.constant 0 : index
    %c0_13 = arith.constant 0 : index
    %8 = vector.load %arg3[%c0_11, %c0_12, %c0_13] : memref<1x8x8xbf16, #tpu.memory_space<vmem>>, vector<1x8x8xbf16>
    %9 = vector.shape_cast %8 : vector<1x8x8xbf16> to vector<8x8xbf16>
    %10 = arith.extf %9 : vector<8x8xbf16> to vector<8x8xf32>
    %cst_14 = arith.constant dense<0.000000e+00> : vector<4x8x8xf32>
    %11 = tpu.matmul %3, %5, %cst_14 {dimension_numbers = #tpu.dot_dimension_numbers<[2], [2], [1], [1], [0, 0, 0, 1, 1, 1], [0], [0]>} : vector<4x8x16xf32>, vector<4x8x16xf32>, vector<4x8x8xf32> -> vector<4x8x8xf32>
    %12 = vector.shape_cast %10 : vector<8x8xf32> to vector<1x8x8xf32>
    %13 = vector.broadcast %12 : vector<1x8x8xf32> to vector<4x8x8xf32>
    %14 = arith.addf %11, %13 : vector<4x8x8xf32>
    %cst_15 = arith.constant dense<0xFF800000> : vector<4x8xf32>
    %15 = vector.multi_reduction <maximumf>, %14, %cst_15 [2] : vector<4x8x8xf32> to vector<4x8xf32>
    %16 = vector.shape_cast %15 : vector<4x8xf32> to vector<4x8x1xf32>
    %17 = vector.broadcast %16 : vector<4x8x1xf32> to vector<4x8x8xf32>
    %18 = arith.subf %14, %17 : vector<4x8x8xf32>
    %19 = math.exp %18 : vector<4x8x8xf32>
    %cst_16 = arith.constant dense<0.000000e+00> : vector<4x8xf32>
    %20 = vector.multi_reduction <add>, %19, %cst_16 [2] : vector<4x8x8xf32> to vector<4x8xf32>
    %21 = vector.shape_cast %20 : vector<4x8xf32> to vector<4x8x1xf32>
    %22 = tpu.reciprocal %21 {approx = true} : vector<4x8x1xf32> -> vector<4x8x1xf32>
    %23 = vector.broadcast %22 : vector<4x8x1xf32> to vector<4x8x8xf32>
    %24 = arith.mulf %19, %23 : vector<4x8x8xf32>
    %25 = arith.truncf %24 : vector<4x8x8xf32> to vector<4x8x8xbf16>
    %26 = arith.truncf %7 : vector<4x8x16xf32> to vector<4x8x16xbf16>
    %cst_17 = arith.constant dense<0.000000e+00> : vector<4x8x16xf32>
    %27 = tpu.matmul %25, %26, %cst_17 {dimension_numbers = #tpu.dot_dimension_numbers<[2], [1], [1], [2], [0, 0, 0, 1, 1, 2], [0], [0]>} : vector<4x8x8xbf16>, vector<4x8x16xbf16>, vector<4x8x16xf32> -> vector<4x8x16xf32>
    %28 = vector.extract_strided_slice %27 {offsets = [0, 0, 0], sizes = [1, 8, 16], strides = [1, 1, 1]} : vector<4x8x16xf32> to vector<1x8x16xf32>
    %29 = vector.shape_cast %28 : vector<1x8x16xf32> to vector<8x16xf32>
    %c0_18 = arith.constant 0 : index
    %c0_19 = arith.constant 0 : index
    %c0_20 = arith.constant 0 : index
    %30 = vector.load %arg7[%c0_18, %c0_19, %c0_20] : memref<1x8x64xf32, #tpu.memory_space<vmem>>, vector<1x8x16xf32>
    %31 = vector.shape_cast %30 : vector<1x8x16xf32> to vector<8x16xf32>
    %32 = vector.shape_cast %29 : vector<8x16xf32> to vector<1x8x16xf32>
    tpu.vector_store %arg7[%c0_18, %c0_19, %c0_20], %32 {strides = array<i32>} : memref<1x8x64xf32, #tpu.memory_space<vmem>>, vector<1x8x16xf32>,
    %33 = vector.extract_strided_slice %27 {offsets = [1, 0, 0], sizes = [1, 8, 16], strides = [1, 1, 1]} : vector<4x8x16xf32> to vector<1x8x16xf32>
    %34 = vector.shape_cast %33 : vector<1x8x16xf32> to vector<8x16xf32>
    %c0_21 = arith.constant 0 : index
    %c0_22 = arith.constant 0 : index
    %c16 = arith.constant 16 : index
    %35 = vector.load %arg7[%c0_21, %c0_22, %c16] : memref<1x8x64xf32, #tpu.memory_space<vmem>>, vector<1x8x16xf32>
    %36 = vector.shape_cast %35 : vector<1x8x16xf32> to vector<8x16xf32>
    %37 = vector.shape_cast %34 : vector<8x16xf32> to vector<1x8x16xf32>
    tpu.vector_store %arg7[%c0_21, %c0_22, %c16], %37 {strides = array<i32>} : memref<1x8x64xf32, #tpu.memory_space<vmem>>, vector<1x8x16xf32>,
    %38 = vector.extract_strided_slice %27 {offsets = [2, 0, 0], sizes = [1, 8, 16], strides = [1, 1, 1]} : vector<4x8x16xf32> to vector<1x8x16xf32>
    %39 = vector.shape_cast %38 : vector<1x8x16xf32> to vector<8x16xf32>
    %c0_23 = arith.constant 0 : index
    %c0_24 = arith.constant 0 : index
    %c32 = arith.constant 32 : index
    %40 = vector.load %arg7[%c0_23, %c0_24, %c32] : memref<1x8x64xf32, #tpu.memory_space<vmem>>, vector<1x8x16xf32>
    %41 = vector.shape_cast %40 : vector<1x8x16xf32> to vector<8x16xf32>
    %42 = vector.shape_cast %39 : vector<8x16xf32> to vector<1x8x16xf32>
    tpu.vector_store %arg7[%c0_23, %c0_24, %c32], %42 {strides = array<i32>} : memref<1x8x64xf32, #tpu.memory_space<vmem>>, vector<1x8x16xf32>,
    %43 = vector.extract_strided_slice %27 {offsets = [3, 0, 0], sizes = [1, 8, 16], strides = [1, 1, 1]} : vector<4x8x16xf32> to vector<1x8x16xf32>
    %44 = vector.shape_cast %43 : vector<1x8x16xf32> to vector<8x16xf32>
    %c0_25 = arith.constant 0 : index
    %c0_26 = arith.constant 0 : index
    %c48 = arith.constant 48 : index
    %45 = vector.load %arg7[%c0_25, %c0_26, %c48] : memref<1x8x64xf32, #tpu.memory_space<vmem>>, vector<1x8x16xf32>
    %46 = vector.shape_cast %45 : vector<1x8x16xf32> to vector<8x16xf32>
    %47 = vector.shape_cast %44 : vector<8x16xf32> to vector<1x8x16xf32>
    tpu.vector_store %arg7[%c0_25, %c0_26, %c48], %47 {strides = array<i32>} : memref<1x8x64xf32, #tpu.memory_space<vmem>>, vector<1x8x16xf32>,
    %c0_27 = arith.constant 0 : index
    %c0_28 = arith.constant 0 : index
    %c0_29 = arith.constant 0 : index
    %c0_30 = arith.constant 0 : index
    %48 = vector.load %arg8[%c0_27, %c0_28, %c0_29, %c0_30] : memref<1x4x8x8xf32, #tpu.memory_space<vmem>>, vector<1x4x8x8xf32>
    %49 = vector.shape_cast %48 : vector<1x4x8x8xf32> to vector<4x8x8xf32>
    %50 = vector.shape_cast %24 : vector<4x8x8xf32> to vector<1x4x8x8xf32>
    tpu.vector_store %arg8[%c0_27, %c0_28, %c0_29, %c0_30], %50 {strides = array<i32>} : memref<1x4x8x8xf32, #tpu.memory_space<vmem>>, vector<1x4x8x8xf32>,
    return
  }
  func.func @transform_0(%arg0: i32, %arg1: i32, %arg2: i32) -> (i32, i32, i32) {
    %c0_i32 = arith.constant 0 : i32
    %c0_i32_0 = arith.constant 0 : i32
    return %arg0, %arg2, %c0_i32 : i32, i32, i32
  }
  func.func @transform_1(%arg0: i32, %arg1: i32, %arg2: i32) -> (i32, i32, i32, i32) {
    %c0_i32 = arith.constant 0 : i32
    %c0_i32_0 = arith.constant 0 : i32
    return %arg0, %arg1, %arg2, %c0_i32 : i32, i32, i32, i32
  }
  func.func @transform_2(%arg0: i32, %arg1: i32, %arg2: i32) -> (i32, i32, i32, i32) {
    %c0_i32 = arith.constant 0 : i32
    %c0_i32_0 = arith.constant 0 : i32
    %c0_i32_1 = arith.constant 0 : i32
    return %arg0, %arg1, %c0_i32, %c0_i32_0 : i32, i32, i32, i32
  }
  func.func @transform_3(%arg0: i32, %arg1: i32, %arg2: i32) -> (i32, i32, i32, i32) {
    %c0_i32 = arith.constant 0 : i32
    %c0_i32_0 = arith.constant 0 : i32
    %c0_i32_1 = arith.constant 0 : i32
    return %arg0, %arg1, %c0_i32, %c0_i32_0 : i32, i32, i32, i32
  }
  func.func @transform_4(%arg0: i32, %arg1: i32, %arg2: i32) -> (i32, i32, i32) {
    %c0_i32 = arith.constant 0 : i32
    return %arg0, %arg2, %arg1 : i32, i32, i32
  }
  func.func @transform_5(%arg0: i32, %arg1: i32, %arg2: i32) -> (i32, i32, i32, i32) {
    %c0_i32 = arith.constant 0 : i32
    %c0_i32_0 = arith.constant 0 : i32
    return %arg0, %arg1, %arg2, %c0_i32 : i32, i32, i32, i32
  }
}

</mosaic_0001>

<bundles_post_ra>
// kernel: tpu_custom_call.1
= control target key start
LH: loop header
LB: loop body
LE: loop exit
PB: predicated region body
PF: predicated region fallthrough
CT: control target
= control target key end

     0   :  { %s2061_s0 = inlined_call_operand.hbm [shape: bf16[2,8,8], index: 0, kind: input, shape index: {}]   ;;  %s2062_s1 = inlined_call_operand.hbm [shape: f32[2,4,8,16], index: 1, kind: input, shape index: {}]   ;;  %s2063_s2 = inlined_call_operand.hbm [shape: f32[2,4,8,16], index: 2, kind: input, shape index: {}]   ;;  %s2064_s3 = inlined_call_operand.hbm [shape: f32[2,4,8,16], index: 3, kind: input, shape index: {}]   ;;  %s2065_s4 = inlined_call_operand.hbm [shape: f32[2,8,64], index: 4, kind: output, shape index: {0}]   ;;  %s2066_s5 = inlined_call_operand.hbm [shape: f32[2,4,8,8], index: 5, kind: output, shape index: {1}]  }
   0x1   :  { %2077 = sst [smem:[#allocation24_spill]] %s2062_s1 }
   0x2   :  { %2078 = sst [smem:[#allocation25_spill]] %s2065_s4 }
   0x3   :  { %11 = vsyncpa [#allocation3], 0 }
   0x4   :  { %13 = vsyncpa [#allocation3 + $0x1], 0 }
   0x5   :  { %14 = vsyncpa [#allocation6], 0 }
   0x6   :  { %16 = vsyncpa [#allocation6 + $0x1], 0 }
   0x7   :  { %17 = vsyncpa [#allocation9], 0 }
   0x8   :  { %19 = vsyncpa [#allocation9 + $0x1], 0 }
   0x9   :  { %20 = vsyncpa [#allocation4], 0 }
   0xa   :  { %22 = vsyncpa [#allocation4 + $0x1], 0 }
   0xb   :  { %23 = vsyncpa [#allocation12], 0 }
   0xc   :  { %25 = vsyncpa [#allocation12 + $0x1], 0  ;;  %s1727_s18 = smov 0   ;;  %s1729_s19 = smov 0  }
   0xd   :  { %s1731_s20 = smov 0   ;;  %s1733_s21 = smov 0  }
   0xe   :  { %s1735_s22 = smov 0   ;;  %s1737_s23 = smov 0  }
   0xf LB: > { %2079 = sst [smem:[#allocation18_spill]] %s1660_s18  ;;  %s1758_s24 = sadd.s32 4294967295, %s1680_s23   ;;  %s1680_s23 = sphi %s1737_s23, %s31_s23   ;;  %s1676_s22 = sphi %s1735_s22, %s2101_s22   ;;  %s1672_s21 = sphi %s1733_s21, %s2100_s21   ;;  %s1668_s20 = sphi %s1731_s20, %s2099_s20   ;;  %s1664_s19 = sphi %s1729_s19, %s2103_s19   ;;  %s1660_s18 = sphi %s1727_s18, %s2102_s18  }
  0x10   : > { %2080 = sst [smem:[#allocation19_spill]] %s1668_s20  ;;  %s1239_s25 = sadd.s32 4294967294, %s1680_s23  }
  0x11   : > { %2081 = sst [smem:[#allocation20_spill]] %s1676_s22  ;;  %s50_s26 = sadd.s32 1, %s1676_s22 }
  0x12   : > { %s59_s27 = sadd.s32 1, %s1668_s20  ;;  %p52_p0 = scmp.ge.s32.totalorder %s50_s26, 2 }
  0x13   : > { %p66_p1 = scmp.ne.s32.totalorder %s1668_s20, %s1664_s19  ;;  %p67_p2 = scmp.eq.s32.totalorder %s1680_s23, 0 }
  0x14   : > { %p72_p3 = scmp.ne.s32.totalorder %s1664_s19, %s1660_s18  ;;  %s2105_s26 = smov (%p52_p0, %s50_s26), 0 }
  0x15   : > { %2082 = sst [smem:[#allocation21_spill]] %s2105_s26  ;;  %p1770_p4 = por %p67_p2, %p66_p1 }
  0x16   : > { %p73_p5 = scmp.eq.s32.totalorder %s1758_s24, 0  ;;  %s54_s29 = ssub.s32 %s1676_s22, %s2105_s26 }
  0x17   : > { %p186_p6 = scmp.eq.s32.totalorder %s1758_s24, 1  ;;  %p57_p7 = scmp.eq.s32.totalorder %s54_s29, 0 }
  0x18   : > { %p1778_p8 = por %p73_p5, %p72_p3  ;;  %p192_p10 = scmp.eq.s32.totalorder %s1239_s25, 1 }
  0x19   : > { %p1782_p9 = por %p186_p6, %p66_p1  ;;  %p1375_p13 = scmp.lt.s32.totalorder %s1680_s23, 2 }
  0x1a   : > { %s1787_s7 = scalar_select %p57_p7, %s1668_s20, %s59_s27  }
  0x1b   : > { %p1789_p11 = por %p192_p10, %p72_p3  ;;  %s1796_s9 = sand.u32 1, %s1668_s20  }
  0x1c   : > { %2086 = sst [smem:[#allocation22_spill]] %s1787_s7  ;;  %s261_s10 = sand.u32 1, %s1680_s23  }
  0x1d   : > { %s2087_s8 = scalar_select %p1789_p11, 1, 0 }
  0x1e   : > { %s1800_s11 = sshll.u32 %s1796_s9, 5  ;;  %p1804_p0 = pnand %p1375_p13, %p1770_p4 }
  0x1f   : > { %2088 = sst [smem:[#allocation23_spill]] %s2087_s8  ;;  %s1809_s13 = sshll.u32 %s1676_s22, 9 }
  0x20   : > { %s2090_s1 = sld [smem:[#allocation24_spill]]  ;;  %s265_s17 = scalar_lea.vmem [#allocation5], %s1800_s11 }
  0x21   : > { %s275_s25 = sshll.u32 %s265_s17, 4  ;;  %s1816_s27 = scalar_lea.sflag [#allocation6], %s261_s10  ;;  %s276_s25 = int_to_ptr.vmem [resolvable:$true] %s275_s25 }
  0x22   : > { %p1452_p1 = pneg %p1804_p0  ;;  %s1463_s28 = scalar_lea.vmem %s276_s25, 512 }
  0x23   : > { %p1464_p2 = scmp.ne.s32.totalorder %s276_s25, %s1463_s28  ;;  %s1682_s29 = smov [#allocation5]  }
  0x24   : > { %s1468_s26 = sshll.u32 %s1682_s29, 4  ;;  %s1469_s26 = int_to_ptr.vmem [resolvable:$false] %s1468_s26 }
  0x25   : > { %p1466_p3 = pnand %p1464_p2, %p1452_p1  ;;  %s1470_s7 = scalar_lea.vmem %s1469_s26, 1024 }
  0x26   : > { %s274_s16 = scalar_lea.hbm %s2090_s1, %s1809_s13  ;;  %p1471_p5 = scmp.lt.s32.totalorder %s276_s25, %s1469_s26 }
  0x27   : > { %p1467_p4 = pneg %p1466_p3  ;;  %p1472_p6 = scmp.lt.s32.totalorder %s1470_s7, %s1463_s28 }
  0x29   : > { %p1473_p7 = por %p1472_p6, %p1471_p5 }
  0x2b   : > { %p1474_p10 = pnand %p1473_p7, %p1467_p4 }
  0x2d   : > { %1477 = shalt.err (!%p1474_p10)
}
  0x2e   : > { %s2072_s14 = smov 128   ;;  %s2074_s10 = smov 8  }
  0x2f   : > { %1361 = dma.hbm_to_vmem [thread:$0]  (!%p1804_p0), %s274_s16, 512, %s276_s25, %s1816_s27, %s2072_s14, %s2072_s14, %s2074_s10  }
  0x30   : > { %p1253_p13 = scmp.ge.s32.totalorder %s1680_s23, 1  ;;  %p329_p2 = scmp.lt.s32.totalorder %s1680_s23, 3 }
  0x31   : > { %s1242_s7 = sshll.u32 %s1796_s9, 2  ;;  %s1243_s15 = sshll.u32 %s1676_s22, 6 }
  0x32   : > { %p1831_p3 = pnand %p1253_p13, %p329_p2  ;;  %s252_s29 = scalar_lea.hbm %s2061_s0, %s1243_s15 }
  0x33   : > { %s246_s1 = scalar_lea.vmem [#allocation2], %s1242_s7  ;;  %s297_s4 = scalar_lea.hbm %s2063_s2, %s1809_s13 }
  0x34   : > { %s254_s20 = sshll.u32 %s246_s1, 4  ;;  %s243_s16 = scalar_lea.sflag [#allocation3], %s1796_s9  ;;  %s255_s20 = int_to_ptr.vmem [resolvable:$true] %s254_s20 }
  0x35   : > { %s1491_s25 = scalar_lea.vmem %s255_s20, 64  ;;  %s1685_s14 = smov [#allocation2]  }
  0x36   : > { %p1492_p4 = scmp.ne.s32.totalorder %s255_s20, %s1491_s25  ;;  %s1496_s10 = sshll.u32 %s1685_s14, 4  ;;  %s1497_s10 = int_to_ptr.vmem [resolvable:$false] %s1496_s10 }
  0x37   : > { %s1498_s22 = scalar_lea.vmem %s1497_s10, 128  ;;  %p1499_p7 = scmp.lt.s32.totalorder %s255_s20, %s1497_s10 }
  0x38   : > { %p1494_p5 = pnand %p1492_p4, %p1452_p1  ;;  %p1500_p10 = scmp.lt.s32.totalorder %s1498_s22, %s1491_s25 }
  0x3a   : > { %p1495_p6 = pneg %p1494_p5  ;;  %p1501_p13 = por %p1500_p10, %p1499_p7 }
  0x3c   : > { %p1502_p2 = pnand %p1501_p13, %p1495_p6 }
  0x3e   : > { %1505 = shalt.err (!%p1502_p2)
}
  0x3f   : > { %1358 = dma.hbm_to_vmem [thread:$0]  (!%p1804_p0), %s252_s29, 64, %s255_s20, %s243_s16  }
  0x40   : > { %s289_s1 = scalar_lea.vmem [#allocation7], %s1800_s11  ;;  %s1686_s14 = smov [#allocation7]  }
  0x41   : > { %s298_s18 = sshll.u32 %s289_s1, 4  ;;  %s1524_s10 = sshll.u32 %s1686_s14, 4  ;;  %s299_s18 = int_to_ptr.vmem [resolvable:$true] %s298_s18  ;;  %s1525_s10 = int_to_ptr.vmem [resolvable:$false] %s1524_s10 }
  0x42   : > { %s1519_s8 = scalar_lea.vmem %s299_s18, 512  ;;  %s1526_s22 = scalar_lea.vmem %s1525_s10, 1024 }
  0x43   : > { %p1520_p4 = scmp.ne.s32.totalorder %s299_s18, %s1519_s8  ;;  %p1527_p6 = scmp.lt.s32.totalorder %s299_s18, %s1525_s10 }
  0x44   : > { %p1528_p7 = scmp.lt.s32.totalorder %s1526_s22, %s1519_s8 }
  0x45   : > { %p1522_p5 = pnand %p1520_p4, %p1452_p1 }
  0x46   : > { %p1529_p10 = por %p1528_p7, %p1527_p6 }
  0x47   : > { %p1523_p12 = pneg %p1522_p5 }
  0x49   : > { %p1530_p13 = pnand %p1529_p10, %p1523_p12 }
  0x4b   : > { %1533 = shalt.err (!%p1530_p13)
}
  0x4c   : > { %s2092_s20 = smov 8   ;;  %s2093_s7 = smov 128  }
  0x4d   : > { %1364 = dma.hbm_to_vmem [thread:$0]  (!%p1804_p0), %s297_s4, 512, %s299_s18, %s1816_s27, %s2093_s7, %s2093_s7, %s2092_s20  }
  0x4e   : > { %s320_s16 = scalar_lea.hbm %s2064_s3, %s1809_s13  ;;  %s312_s25 = scalar_lea.vmem [#allocation8], %s1800_s11 }
  0x4f   : > { %s321_s1 = sshll.u32 %s312_s25, 4  ;;  %s309_s8 = scalar_lea.sflag [#allocation9], %s1796_s9  ;;  %s322_s1 = int_to_ptr.vmem [resolvable:$true] %s321_s1 }
  0x50   : > { %s1547_s14 = scalar_lea.vmem %s322_s1, 512  ;;  %s1687_s10 = smov [#allocation8]  }
  0x51   : > { %p1548_p12 = scmp.ne.s32.totalorder %s322_s1, %s1547_s14  ;;  %s1552_s22 = sshll.u32 %s1687_s10, 4  ;;  %s1553_s22 = int_to_ptr.vmem [resolvable:$false] %s1552_s22 }
  0x52   : > { %s1554_s15 = scalar_lea.vmem %s1553_s22, 1024  ;;  %p1555_p5 = scmp.lt.s32.totalorder %s322_s1, %s1553_s22 }
  0x53   : > { %p1550_p2 = pnand %p1548_p12, %p1452_p1  ;;  %p1556_p6 = scmp.lt.s32.totalorder %s1554_s15, %s1547_s14 }
  0x55   : > { %p1551_p4 = pneg %p1550_p2  ;;  %p1557_p7 = por %p1556_p6, %p1555_p5 }
  0x57   : > { %p1558_p10 = pnand %p1557_p7, %p1551_p4 }
  0x59   : > { %1561 = shalt.err (!%p1558_p10)
}
  0x5a   : > { %1367 = dma.hbm_to_vmem [thread:$0]  (!%p1804_p0), %s320_s16, 512, %s322_s1, %s309_s8, %s2093_s7, %s2093_s7, %s2092_s20  }
  0x5b   : > { %333 = sbr.rel (%p1831_p3) target bundleno = 963 (0x3c3), region = 36  ;;  %s1882_s4 = sand.u32 (!%p1831_p3), 1, %s1664_s19  }
  0x5c   : > { %s1254_s9 = sshll.u32 (!%p1831_p3), %s1882_s4, 2  ;;  %s336_s11 = scalar_lea.sflag (!%p1831_p3), [#allocation3], %s1882_s4 }
  0x5d   : > { %s1886_s13 = scalar_lea.vmem (!%p1831_p3), [#allocation2], %s1254_s9 }
  0x60   : > { %1639 = dma.done.wait (%p1778_p8), %s336_s11, 64  }
  0x61   : > { %1641 = vsyncadd (%p1778_p8), %s336_s11, 4294967232  ;;  %s344_s12 = sand.u32 1, %s1758_s24   ;;  %s1894_s27 = sshll.u32 %s1882_s4, 5 }
  0x62   : > { %s345_s26 = scalar_lea.sflag [#allocation6], %s344_s12  ;;  %s348_s18 = scalar_lea.vmem [#allocation5], %s1894_s27 }
  0x63   : > { %1643 = dma.done.wait (%p1778_p8), %s345_s26, 1024  }
  0x64   : > { %1645 = vsyncadd (%p1778_p8), %s345_s26, 4294966272  ;;  %s357_s20 = scalar_lea.vmem [#allocation7], %s1894_s27  ;;  %s363_s7 = scalar_lea.sflag [#allocation9], %s1882_s4 }
  0x65   : > { %s1904_s17 = scalar_lea.vmem [#allocation8], %s1894_s27 }
  0x66   : > { %1647 = dma.done.wait (%p1778_p8), %s363_s7, 512  }
  0x67   : > { %1649 = vsyncadd (%p1778_p8), %s363_s7, 4294966784  ;;  %v1688_v0 = vmov 0.0   ;;  %vm1689_vm0 = vmmov 0   ;;  %vm436_vm1 = vcmask 130048   ;;  %v426_v1 = vld [vmem:[%s357_s20] sm:$0xff]  ;;  %v427_v2 = vld [vmem:[%s357_s20 + $0x8] sm:$0xff] }
  0x68   : > { %1299 = vmatprep.subr.mxu0 %v1688_v0  ;;  %1304 = vmatprep.subr.mxu1 %v1688_v0  ;;  %v418_v3 = vld [vmem:[%s348_s18] sm:$0xff]  ;;  %v419_v5 = vld [vmem:[%s348_s18 + $0x8] sm:$0xff]  ;;  %v420_v6 = vld [vmem:[%s348_s18 + $0x10] sm:$0xff]  ;;  %vm741_vm2 = vcmask 64512   ;;  %vm797_vm3 = vcmask 1043456   ;;  %s1954_s24 = scalar_lea.vmem [#allocation11], %s1894_s27 }
  0x69   : > { %1301 = vmatprep.mubr.msk.f32.mxu0 %vm1689_vm0, %v1688_v0  ;;  %1306 = vmatprep.mubr.msk.f32.mxu1 %vm1689_vm0, %v1688_v0  ;;  %v422_v4 = vmul.f32 0.25, %v418_v3  ;;  %v428_v7 = vld [vmem:[%s357_s20 + $0x10] sm:$0xff]  ;;  %v423_v8 = vmul.f32 0.25, %v419_v5  ;;  %v421_v9 = vld [vmem:[%s348_s18 + $0x18] sm:$0xff]  ;;  %v424_v11 = vmul.f32 0.25, %v420_v6  ;;  %v430_v51 = vld [vmem:[%s1904_s17] sm:$0xff] }
  0x6a   : > { %1300 = vmatpush3.xpose.msk.msra.mxu0 %vm436_vm1, %v426_v1  ;;  %1305 = vmatpush3.xpose.msk.msra.mxu1 %vm436_vm1, %v427_v2  ;;  %v429_v10 = vld [vmem:[%s357_s20 + $0x18] sm:$0xff]  ;;  %v425_v12 = vmul.f32 0.25, %v421_v9  ;;  %v790_v52 = vpack.c.bf16 %v430_v51, %v430_v51  ;;  %v431_v54 = vld [vmem:[%s1904_s17 + $0x8] sm:$0xff]  ;;  %v432_v61 = vld [vmem:[%s1904_s17 + $0x10] sm:$0xff]  ;;  %s1258_s30 = sshll.u32 %s1882_s4, 3  ;;  %s1282_s29 = sshll.u32 %s1672_s21, 9 }
  0x6b   : > { %1309 = vmatprep.subr.mxu0 %v1688_v0  ;;  %1314 = vmatprep.subr.mxu1 %v1688_v0  ;;  %v434_v13 = vld [vmem:[%s1886_s13] sm:$0xf]  ;;  %v791_v55 = vpack.c.bf16 %v431_v54, %v431_v54  ;;  %v792_v62 = vpack.c.bf16 %v432_v61, %v432_v61  ;;  %s1975_s28 = scalar_lea.vmem [#allocation10], %s1258_s30  ;;  %s1039_s16 = sshll.u32 %s1954_s24, 4  ;;  %s1986_s16 = int_to_ptr.vmem [resolvable:$true] %s1039_s16 }
  0x6c   : > { %v435_v14 = vunpack.c.l.bf16 %v434_v13  ;;  %v799_v53 = vsel %vm797_vm3, %v790_v52, 0  ;;  %v433_v1 = vld [vmem:[%s1904_s17 + $0x18] sm:$0xff]  ;;  %s1984_s8 = scalar_lea.hbm %s2066_s5, %s1282_s29  ;;  %s1690_s14 = smov 16  }
  0x6d   : > { %1302 = vmatmul.mubr.msk.f32.vlgmr.msra.gmra.mxu0 %vm436_vm1, %v422_v4  ;;  %1307 = vmatmul.mubr.msk.f32.vlgmr.msra.gmra.mxu1 %vm436_vm1, %v423_v8  ;;  %v845_v56 = vsel %vm797_vm3, %v791_v55, 0  ;;  %v891_v4 = vsel %vm797_vm3, %v792_v62, 0  ;;  %v793_v5 = vpack.c.bf16 %v433_v1, %v433_v1  ;;  %s1008_s10 = scalar_lea.sflag [#allocation12], %s1882_s4  ;;  %s1562_s22 = scalar_lea.vmem %s1986_s16, 512 }
  0x6e   : > { %1310 = vmatpush3.xpose.msk.msra.mxu0 %vm436_vm1, %v428_v7  ;;  %1311 = vmatprep.mubr.msk.f32.mxu0 %vm1689_vm0, %v1688_v0  ;;  %p1563_p8 = scmp.ne.s32.totalorder %s1986_s16, %s1562_s22  ;;  %s1691_s15 = smov [#allocation11]  }
  0x6f   : > { %1315 = vmatpush3.xpose.msk.msra.mxu1 %vm436_vm1, %v429_v10  ;;  %1316 = vmatprep.mubr.msk.f32.mxu1 %vm1689_vm0, %v1688_v0  ;;  %s1566_s9 = sshll.u32 %s1691_s15, 4  ;;  %s1567_s9 = int_to_ptr.vmem [resolvable:$false] %s1566_s9 }
  0x70   : > { %1319 = vmatprep.subr.bf16.mxu0 %v1688_v0  ;;  %1325 = vmatprep.subr.bf16.mxu1 %v1688_v0  ;;  %p1564_p0 = pnand %p1563_p8, %p1782_p9  ;;  %s1568_s11 = scalar_lea.vmem %s1567_s9, 1024 }
  0x71   : > { %1312 = vmatmul.mubr.msk.f32.vlgmr.msra.gmra.mxu0 %vm436_vm1, %v424_v11  ;;  %v937_v11 = vsel %vm797_vm3, %v793_v5, 0  ;;  %p1569_p3 = scmp.lt.s32.totalorder %s1986_s16, %s1567_s9  ;;  %p1570_p13 = scmp.lt.s32.totalorder %s1568_s11, %s1562_s22 }
  0x72   : > { %1317 = vmatmul.mubr.msk.f32.vlgmr.msra.gmra.mxu1 %vm436_vm1, %v425_v12  ;;  %1321 = vmatprep.mubr.msk.bf16.mxu0 %vm1689_vm0, %v1688_v0  ;;  %p1565_p1 = pneg %p1564_p0 }
  0x73   : > { %1327 = vmatprep.mubr.msk.bf16.mxu1 %vm1689_vm0, %v1688_v0  ;;  %1320 = vmatpush3.bf16.msra.mxu0 %v799_v53  ;;  %p1571_p12 = por %p1570_p13, %p1569_p3 }
  0x74   : > { %1331 = vmatprep.subr.bf16.mxu0 %v1688_v0  ;;  %1326 = vmatpush3.bf16.msra.mxu1 %v845_v56 }
  0x75   : > { %1337 = vmatprep.subr.bf16.mxu1 %v1688_v0  ;;  %p1572_p2 = pnand %p1571_p12, %p1565_p1 }
 0x12d   : > { %v509_v15 = vpop.f32.mrf.mxu0  ;;  %v585_v16 = vpop.f32.mrf.mxu1 }
 0x12e   : > { %v510_v17 = vadd.f32 %v509_v15, %v435_v14  ;;  %v586_v18 = vadd.f32 %v585_v16, %v435_v14 }
 0x12f   : > { %v1303_v19 = vpop.f32.mrf.mxu0  ;;  %v1308_v20 = vpop.f32.mrf.mxu1 }
 0x130   : > { %v742_v21 = vsel %vm741_vm2, %v510_v17, -inf  ;;  %v745_v25 = vsel %vm741_vm2, %v586_v18, -inf }
 0x131   : > { %743 = vmax.xlane.f32.xlu0 %v742_v21  ;;  %v661_v22 = vpop.f32.mrf.mxu0 }
 0x132   : > { %v662_v23 = vadd.f32 %v661_v22, %v435_v14  ;;  %v737_v24 = vpop.f32.mrf.mxu1 }
 0x133   : > { %v738_v26 = vadd.f32 %v737_v24, %v435_v14  ;;  %v1313_v27 = vpop.f32.mrf.mxu0 }
 0x134   : > { %v748_v28 = vsel %vm741_vm2, %v662_v23, -inf  ;;  %v1318_v29 = vpop.f32.mrf.mxu1 }
 0x135   : > { %746 = vmax.xlane.f32.xlu0 %v745_v25  ;;  %749 = vmax.xlane.f32.xlu1 %v748_v28  ;;  %v751_v30 = vsel %vm741_vm2, %v738_v26, -inf }
 0x139   : > { %752 = vmax.xlane.f32.xlu1 %v751_v30 }
 0x1ba   : > { %v744_v31 = vpop.xlane.xlu0 %743 }
 0x1bb   : > { %v754_v32 = vsub.f32 %v510_v17, %v744_v31 }
 0x1bd   : > { %v758_v33 = vmul.f32 1.442695, %v754_v32 }
 0x1be   : > { %v747_v34 = vpop.xlane.xlu0 %746  ;;  %v750_v35 = vpop.xlane.xlu1 %749 }
 0x1bf   : > { %1434 = vpow2.f32 %v758_v33  ;;  %v755_v36 = vsub.f32 %v586_v18, %v747_v34  ;;  %v756_v37 = vsub.f32 %v662_v23, %v750_v35 }
 0x1c1   : > { %v760_v38 = vmul.f32 1.442695, %v755_v36  ;;  %v762_v39 = vmul.f32 1.442695, %v756_v37 }
 0x1c2   : > { %v753_v40 = vpop.xlane.xlu1 %752 }
 0x1c3   : > { %1436 = vpow2.f32 %v760_v38  ;;  %v757_v41 = vsub.f32 %v738_v26, %v753_v40 }
 0x1c4   : > { %1438 = vpow2.f32 %v762_v39 }
 0x1c5   : > { %v764_v42 = vmul.f32 1.442695, %v757_v41 }
 0x1c7   : > { %1440 = vpow2.f32 %v764_v42 }
 0x1cc   : > { %v1435_v43 = vpop.eup %1434 }
 0x1cd   : > { %v766_v44 = vsel %vm741_vm2, %v1435_v43, 0.0 }
 0x1ce   : > { %767 = vadd.xlane.f32.xlu0 %v766_v44 }
 0x1d0   : > { %v1437_v45 = vpop.eup %1436 }
 0x1d1   : > { %v1439_v46 = vpop.eup %1438  ;;  %v769_v47 = vsel %vm741_vm2, %v1437_v45, 0.0 }
 0x1d2   : > { %770 = vadd.xlane.f32.xlu1 %v769_v47  ;;  %v772_v48 = vsel %vm741_vm2, %v1439_v46, 0.0 }
 0x1d3   : > { %773 = vadd.xlane.f32.xlu0 %v772_v48 }
 0x1d4   : > { %v1441_v49 = vpop.eup %1440 }
 0x1d5   : > { %v775_v50 = vsel %vm741_vm2, %v1441_v49, 0.0 }
 0x1d6   : > { %776 = vadd.xlane.f32.xlu1 %v775_v50 }
 0x257   : > { %v768_v57 = vpop.xlane.xlu0 %767 }
 0x258   : > { %1442 = vrcp.f32 %v768_v57 }
 0x25b   : > { %v771_v58 = vpop.xlane.xlu1 %770 }
 0x25c   : > { %v774_v59 = vpop.xlane.xlu0 %773  ;;  %1444 = vrcp.f32 %v771_v58 }
 0x25d   : > { %1446 = vrcp.f32 %v774_v59 }
 0x25f   : > { %v777_v60 = vpop.xlane.xlu1 %776 }
 0x260   : > { %1448 = vrcp.f32 %v777_v60 }
 0x265   : > { %v1443_v63 = vpop.eup %1442 }
 0x266   : > { %v782_v2 = vmul.f32 %v1443_v63, %v1435_v43 }
 0x268   : > { %v786_v3 = vpack.c.bf16 %v782_v2, %v782_v2  ;;  %998 = vst.msk [vmem:[%s1954_s24] sm:$0xff] %vm741_vm2, %v782_v2 }
 0x269   : > { %v1445_v6 = vpop.eup %1444 }
 0x26a   : > { %v1447_v7 = vpop.eup %1446  ;;  %1322 = vmatmul.mubr.msk.bf16.vlgmr.msra.gmra.mxu0 %vm741_vm2, %v786_v3  ;;  %v783_v8 = vmul.f32 %v1445_v6, %v1437_v45 }
 0x26b   : > { %1332 = vmatpush3.bf16.msra.mxu0 %v891_v4  ;;  %1333 = vmatprep.mubr.msk.bf16.mxu0 %vm1689_vm0, %v1688_v0  ;;  %v784_v9 = vmul.f32 %v1447_v7, %v1439_v46 }
 0x26c   : > { %v787_v10 = vpack.c.bf16 %v783_v8, %v783_v8  ;;  %999 = vst.msk [vmem:[%s1954_s24 + $0x8] sm:$0xff] %vm741_vm2, %v783_v8 }
 0x26d   : > { %v1449_v12 = vpop.eup %1448  ;;  %1000 = vst.msk [vmem:[%s1954_s24 + $0x10] sm:$0xff] %vm741_vm2, %v784_v9  ;;  %v788_v14 = vpack.c.bf16 %v784_v9, %v784_v9 }
 0x26e   : > { %1328 = vmatmul.mubr.msk.bf16.vlgmr.msra.gmra.mxu1 %vm741_vm2, %v787_v10  ;;  %v785_v13 = vmul.f32 %v1449_v12, %v1441_v49 }
 0x26f   : > { %1338 = vmatpush3.bf16.msra.mxu1 %v937_v11  ;;  %1339 = vmatprep.mubr.msk.bf16.mxu1 %vm1689_vm0, %v1688_v0 }
 0x270   : > { %1001 = vst.msk [vmem:[%s1954_s24 + $0x18] sm:$0xff] %vm741_vm2, %v785_v13  ;;  %v789_v15 = vpack.c.bf16 %v785_v13, %v785_v13 }
 0x272   : > { %1334 = vmatmul.mubr.msk.bf16.vlgmr.msra.gmra.mxu0 %vm741_vm2, %v788_v14 }
 0x276   : > { %1340 = vmatmul.mubr.msk.bf16.vlgmr.msra.gmra.mxu1 %vm741_vm2, %v789_v15 }
 0x32a   : > { %v835_v16 = vpop.f32.mrf.mxu0 }
 0x32b   : > { %979 = vst.msk [vmem:[%s1975_s28] sm:$0xff] %vm436_vm1, %v835_v16 }
 0x32c   : > { %v1323_v17 = vpop.f32.mrf.mxu0 }
 0x32e   : > { %v838_v0 = vpop.f32.mrf.mxu0  ;;  %v881_v18 = vpop.f32.mrf.mxu1 }
 0x32f   : > { %981 = vrot.lane.b32.xlu0 %v881_v18, %s1690_s14 }
 0x330   : > { %v1324_v19 = vpop.f32.mrf.mxu0  ;;  %v1329_v20 = vpop.f32.mrf.mxu1 }
 0x331   : > { %1575 = shalt.err (!%p1572_p2)
}
 0x332   : > { %s1576_s13 = scalar_lea.hbm %s1984_s8, 512  ;;  %s1580_s26 = scalar_lea.hbm %s2066_s5, 1024 }
 0x333   : > { %p1577_p4 = scmp.ne.s32.totalorder %s1984_s8, %s1576_s13  ;;  %p1581_p7 = scmp.lt.s32.totalorder %s1984_s8, %s2066_s5 }
 0x334   : > { %p1582_p10 = scmp.lt.s32.totalorder %s1580_s26, %s1576_s13 }
 0x335   : > { %p1578_p5 = pnand %p1577_p4, %p1782_p9 }
 0x336   : > { %p1583_p8 = por %p1582_p10, %p1581_p7 }
 0x337   : > { %p1579_p6 = pneg %p1578_p5 }
 0x339   : > { %p1584_p0 = pnand %p1583_p8, %p1579_p6 }
 0x33b   : > { %1587 = shalt.err (!%p1584_p0)
}
 0x33c   : > { %s1692_s7 = smov 128   ;;  %s1693_s17 = smov 8   ;;  %v884_v21 = vpop.f32.mrf.mxu1  ;;  %v927_v22 = vpop.f32.mrf.mxu0  ;;  %vm984_vm4 = vcmask 261248   ;;  %vm990_vm5 = vcmask 392448   ;;  %vm996_vm6 = vcmask 523648  }
 0x33d   : > { %1352 = dma.vmem_to_hbm [thread:$0]  (%p1782_p9), %s1986_s16, 512, %s1984_s8, %s1008_s10, %s1692_s7, %s1692_s7, %s1693_s17  }
 0x33e   : > { %s1694_s24 = smov 32   ;;  %v1330_v23 = vpop.f32.mrf.mxu1  ;;  %v1335_v24 = vpop.f32.mrf.mxu0  ;;  %s1695_s30 = smov 48  }
 0x33f   : > { %987 = vrot.lane.b32.xlu1 %v927_v22, %s1694_s24  ;;  %s1274_s29 = sshll.u32 %s1672_s21, 7  ;;  %s1023_s16 = sshll.u32 %s1975_s28, 4  ;;  %s1024_s16 = int_to_ptr.vmem [resolvable:$true] %s1023_s16 }
 0x340   : > { %v930_v25 = vpop.f32.mrf.mxu0  ;;  %v973_v26 = vpop.f32.mrf.mxu1  ;;  %s2094_s8 = sld [smem:[#allocation25_spill]]  ;;  %s1003_s10 = scalar_lea.sflag [#allocation4], %s1882_s4 }
 0x341   : > { %s1588_s22 = scalar_lea.vmem %s1024_s16, 128  ;;  %s1696_s15 = smov [#allocation10]  }
 0x342   : > { %v1336_v27 = vpop.f32.mrf.mxu0  ;;  %v1341_v28 = vpop.f32.mrf.mxu1  ;;  %p1589_p1 = scmp.ne.s32.totalorder %s1024_s16, %s1588_s22  ;;  %s1592_s9 = sshll.u32 %s1696_s15, 4  ;;  %s1593_s9 = int_to_ptr.vmem [resolvable:$false] %s1592_s9 }
 0x343   : > { %993 = vrot.lane.b32.xlu1 %v973_v26, %s1695_s30  ;;  %s1594_s21 = scalar_lea.vmem %s1593_s9, 256  ;;  %p1595_p12 = scmp.lt.s32.totalorder %s1024_s16, %s1593_s9 }
 0x344   : > { %v976_v29 = vpop.f32.mrf.mxu1  ;;  %p1590_p3 = pnand %p1589_p1, %p1782_p9  ;;  %p1596_p2 = scmp.lt.s32.totalorder %s1594_s21, %s1588_s22 }
 0x346   : > { %v1342_v30 = vpop.f32.mrf.mxu1  ;;  %s2018_s14 = scalar_lea.hbm %s2094_s8, %s1274_s29  ;;  %p1591_p13 = pneg %p1590_p3 }
 0x347   : > { %p1597_p4 = por %p1596_p2, %p1595_p12 }
 0x349   : > { %p1598_p5 = pnand %p1597_p4, %p1591_p13 }
 0x3a1   : > { %v982_v31 = vpop.permute.xlu0 %981 }
 0x3a2   : > { %985 = vst.msk [vmem:[%s1975_s28] sm:$0xff] %vm984_vm4, %v982_v31 }
 0x3b1   : > { %v988_v32 = vpop.permute.xlu1 %987 }
 0x3b2   : > { %991 = vst.msk [vmem:[%s1975_s28] sm:$0xff] %vm990_vm5, %v988_v32 }
 0x3b5   : > { %v994_v33 = vpop.permute.xlu1 %993 }
 0x3b6   : > { %997 = vst.msk [vmem:[%s1975_s28] sm:$0xff] %vm996_vm6, %v994_v33 }
 0x3b7   : > { %1601 = shalt.err (!%p1598_p5)
}
 0x3b8   : > { %s1602_s28 = scalar_lea.hbm %s2018_s14, 128  ;;  %s1606_s13 = scalar_lea.hbm %s2094_s8, 256 }
 0x3b9   : > { %p1603_p6 = scmp.ne.s32.totalorder %s2018_s14, %s1602_s28  ;;  %p1607_p8 = scmp.lt.s32.totalorder %s2018_s14, %s2094_s8 }
 0x3ba   : > { %p1608_p0 = scmp.lt.s32.totalorder %s1606_s13, %s1602_s28 }
 0x3bb   : > { %p1604_p7 = pnand %p1603_p6, %p1782_p9 }
 0x3bc   : > { %p1609_p1 = por %p1608_p0, %p1607_p8 }
 0x3bd   : > { %p1605_p10 = pneg %p1604_p7 }
 0x3bf   : > { %p1610_p3 = pnand %p1609_p1, %p1605_p10 }
 0x3c1   : > { %1613 = shalt.err (!%p1610_p3)
}
 0x3c2   : > { %1351 = dma.vmem_to_hbm [thread:$0]  (%p1782_p9), %s1024_s16, 128, %s2018_s14, %s1003_s10  }
 0x3c3 PF: > { %s2095_s26 = sld [smem:[#allocation18_spill]]  ;;  %p2097_p13 = scmp.ge.s32.totalorder %s1680_s23, 2 }
 0x3c5   : > { %p1369_p12 = pnand %p2097_p13, %p1789_p11 }
 0x3c7   : > { %p1370_p2 = pneg %p1369_p12 }
 0x3c9   : > { %s1054_s20 = sand.u32 1, %s2095_s26  }
 0x3ca   : > { %s1055_s7 = scalar_lea.sflag [#allocation4], %s1054_s20 }
 0x3cb   : > { %1651 = dma.done.wait (%p1370_p2), %s1055_s7, 128  }
 0x3cc   : > { %1653 = vsyncadd (%p1370_p2), %s1055_s7, 4294967168  ;;  %s1064_s17 = scalar_lea.sflag [#allocation12], %s1054_s20 }
 0x3cd   : > { %1655 = dma.done.wait (%p1370_p2), %s1064_s17, 512  }
 0x3ce   : > { %1657 = vsyncadd (%p1370_p2), %s1064_s17, 4294966784  ;;  %s31_s23 = sadd.s32 1, %s1680_s23   ;;  %s2098_s6 = sld [smem:[#allocation19_spill]] }
 0x3cf   : > { %p28_p4 = scmp.ge.s32.totalorder %s31_s23, 4   ;;  %s2099_s20 = sld [smem:[#allocation22_spill]] }
 0x3d0   : > { %s2100_s21 = sld [smem:[#allocation20_spill]]  ;;  %s2102_s18 = smov %s1664_s19 }
 0x3d1   : > { %s2101_s22 = sld [smem:[#allocation21_spill]]  ;;  %30 = sbr.rel (!%p28_p4) target bundleno = 15 (0xf), region = 135 }
 0x3d4   : > { %s2103_s19 = smov %s2098_s6 }
 0x3d6   :  { %1069 = vsyncpa [#allocation3], 1 }
 0x3d7   :  { %1071 = vsyncpa [#allocation3 + $0x1], 1 }
 0x3d8   :  { %1072 = vsyncpa [#allocation6], 1 }
 0x3d9   :  { %1074 = vsyncpa [#allocation6 + $0x1], 1 }
 0x3da   :  { %1075 = vsyncpa [#allocation9], 1 }
 0x3db   :  { %1077 = vsyncpa [#allocation9 + $0x1], 1 }
 0x3dc   :  { %1078 = vsyncpa [#allocation4], 1 }
 0x3dd   :  { %1080 = vsyncpa [#allocation4 + $0x1], 1 }
 0x3de   :  { %1081 = vsyncpa [#allocation12], 1 }
 0x3df   :  { %1083 = vsyncpa [#allocation12 + $0x1], 1 }

</bundles_post_ra>
